<compile_context>
chip_gen: v7x
topology: tpu7x:2x2x1
jax: 0.10.0
libtpu: 0.0.40
codegen_flags: <defaults>
</compile_context>

<pallas_src>
import functools
import math

import jax
import jax.numpy as jnp
from jax.experimental import pallas as pl
from jax.experimental.pallas import tpu as pltpu

LEAKY_SLOPE = 0.01                       # nn.LeakyReLU default negative_slope
_VMEM_TILE_BUDGET = 24 * 1024 * 1024     # per-call working-set target (all gens)


# --------------------------------------------------------------------------- #
# Kernel
# --------------------------------------------------------------------------- #
def _mlp_kernel(x_ref, w1_ref, b1_ref, w2_ref, b2_ref, o_ref):
    # Linear1 on the MXU with f32 accumulation.
    h = jnp.dot(x_ref[...], w1_ref[...], preferred_element_type=jnp.float32)
    h = h + b1_ref[...]
    # LeakyReLU on the f32 accumulator: mul + max (cheaper than cmp + select).
    h = jnp.maximum(h, LEAKY_SLOPE * h)
    # Cast once, right before the second dot (no-op for f32 weights; explicit
    # precision choice if bf16 weights are supplied).
    out = jnp.dot(h.astype(w2_ref.dtype), w2_ref[...],
                  preferred_element_type=jnp.float32)
    out = out + b2_ref[...]
    o_ref[...] = out.astype(o_ref.dtype)


# --------------------------------------------------------------------------- #
# Tiling helpers
# --------------------------------------------------------------------------- #
def _pick_pack(pc_feat_dim, out_dim, target_lanes=256):
    """Logical rows packed per physical row so output stores are lane-dense.

    256-lane packing fills the 2x256x256 MXU on v6e/v7x; on v5e (4x128x128)
    a 256-wide operand just takes two passes, so it is harmless there.
    """
    if out_dim % 128 == 0:
        return 1                                   # already lane-dense
    for lanes in (target_lanes, 128):
        if lanes % out_dim == 0:
            p = lanes // out_dim
            if p * pc_feat_dim <= 2048 and p * out_dim <= 2048:
                return p
    return 1


def _round_up(v, mult):
    return -(-v // mult) * mult


def _choose_block_m(rows, tile_m, lane_in, lane_out, itemsize):
    """Row-tile size: large (amortize ~0.35us/grid-step), multiple of 8,
    >= 2 grid steps when there is enough work (v7x megacore), VMEM-capped."""
    if rows <= 8:
        return rows                                # full-extent block
    bm = max(8, (min(int(tile_m), rows) // 8) * 8)
    if rows >= 16:
        # Leave at least two grid steps so "parallel" can shard across TCs.
        bm = min(bm, _round_up(pl.cdiv(rows, 2), 8))
    # Working set per row: double-buffered x + out tiles and the f32 h temp.
    per_row = 2 * (lane_in + lane_out) * itemsize + lane_out * 4
    bm_vmem = max(8, (_VMEM_TILE_BUDGET // per_row // 8) * 8)
    return min(bm, bm_vmem)


# --------------------------------------------------------------------------- #
# Pallas call on the packed, pack-aligned rows
# --------------------------------------------------------------------------- #
def _packed_mlp(x_k, w1_k, b1_k, w2_k, b2_k, *, tile_m):
    rows, lane_in = x_k.shape
    lane_out = w1_k.shape[1]
    itemsize = jnp.dtype(x_k.dtype).itemsize

    block_m = _choose_block_m(rows, tile_m, lane_in, lane_out, itemsize)
    grid_m = pl.cdiv(rows, block_m)

    weight_bytes = int(
        (w1_k.size + w2_k.size + b1_k.size + b2_k.size)
        * jnp.dtype(w1_k.dtype).itemsize)
    per_row = 2 * (lane_in + lane_out) * itemsize + lane_out * 4
    vmem_need = block_m * per_row + 2 * weight_bytes
    # Explicit scoped-VMEM limit: big tiles overflow v5e's 16 MiB default;
    # keep the value well under v7x's 64 MiB physical per-TC VMEM.
    vmem_limit = int(min(max(2 * vmem_need, 32 * 1024 * 1024),
                         56 * 1024 * 1024))

    bytes_accessed = int(rows * (lane_in + lane_out) * itemsize + weight_bytes)
    flops = int(2 * rows * lane_out * (lane_in + lane_out))   # physical flops

    return pl.pallas_call(
        _mlp_kernel,
        out_shape=jax.ShapeDtypeStruct((rows, lane_out), x_k.dtype),
        grid=(grid_m,),
        in_specs=[
            # x tile streams through VMEM (auto double-buffered).
            # TODO(synk): add pipeline_mode=pl.Buffered(3) here only if xprof
            # shows exposed DMA on the x stream on v7x at the chosen tile.
            pl.BlockSpec((block_m, lane_in), lambda i: (i, 0)),
            pl.BlockSpec((lane_in, lane_out), lambda i: (0, 0)),   # w1 resident
            pl.BlockSpec((1, lane_out), lambda i: (0, 0)),         # b1 resident
            pl.BlockSpec((lane_out, lane_out), lambda i: (0, 0)),  # w2 resident
            pl.BlockSpec((1, lane_out), lambda i: (0, 0)),         # b2 resident
        ],
        out_specs=pl.BlockSpec((block_m, lane_out), lambda i: (i, 0)),
        compiler_params=pltpu.CompilerParams(
            dimension_semantics=("parallel",),
            vmem_limit_bytes=vmem_limit),
        cost_estimate=pl.CostEstimate(
            flops=flops, transcendentals=0, bytes_accessed=bytes_accessed),
    )(x_k, w1_k, b1_k, w2_k, b2_k)


# --------------------------------------------------------------------------- #
# Wrapper
# --------------------------------------------------------------------------- #
def _reference(x, w1, b1, w2, b2):
    h = jnp.dot(x, w1) + b1
    h = jnp.maximum(h, LEAKY_SLOPE * h)
    return jnp.dot(h, w2) + b2


@functools.partial(jax.jit, static_argnames=("pack", "tile_m"))
def _apply(x, w1, b1, w2, b2, w1_k, b1_k, w2_k, b2_k, *, pack, tile_m):
    pc_feat_dim = x.shape[-1]
    out_dim = w1.shape[1]
    lead_shape = x.shape[:-1]
    m = int(math.prod(lead_shape)) if lead_shape else 1
    x2d = x.reshape(m, pc_feat_dim)

    # Pack-aligned prefix -> Pallas kernel; < pack leftover rows -> plain jnp.
    # No whole-tensor jnp.pad and no slice of a padded output (those were full
    # extra HBM round trips on a memory-bound kernel).
    m_main = (m // pack) * pack
    m_tail = m - m_main

    parts = []
    if m_main > 0:
        rows = m_main // pack
        x_main = x2d if m_tail == 0 else jax.lax.slice_in_dim(x2d, 0, m_main, axis=0)
        x_k = x_main.reshape(rows, pack * pc_feat_dim)   # free row-major re-view
        out_k = _packed_mlp(x_k, w1_k, b1_k, w2_k, b2_k, tile_m=tile_m)
        parts.append(out_k.reshape(m_main, out_dim))     # free re-view back
    if m_tail > 0:
        x_tail = jax.lax.slice_in_dim(x2d, m_main, m, axis=0)
        parts.append(_reference(x_tail, w1, b1, w2, b2).astype(x.dtype))

    out2d = parts[0] if len(parts) == 1 else jnp.concatenate(parts, axis=0)
    return out2d.reshape(*lead_shape, out_dim)


def make_corr_aggregator_cr(w1, b1, w2, b2, *, tile_m=8192, target_lanes=256):
    """Build the forward fn.  Weights are stored (in, out) so the kernel
    computes x @ W + b directly (transpose of PyTorch's (out, in) layout).

    The block-diagonal (kron-replicated) weights and tiled biases are built
    ONCE here, outside the per-call jitted path.
    """
    pc_feat_dim, out_dim = w1.shape
    pack = _pick_pack(pc_feat_dim, out_dim, target_lanes)
    if pack > 1:
        eye = jnp.eye(pack, dtype=w1.dtype)
        w1_k = jnp.kron(eye, w1)
        w2_k = jnp.kron(eye.astype(w2.dtype), w2)
        b1_k = jnp.tile(b1, pack).reshape(1, pack * out_dim)
        b2_k = jnp.tile(b2, pack).reshape(1, pack * out_dim)
    else:
        w1_k, w2_k = w1, w2
        b1_k = b1.reshape(1, out_dim)
        b2_k = b2.reshape(1, out_dim)

    def forward(x):
        return _apply(x, w1, b1, w2, b2, w1_k, b1_k, w2_k, b2_k,
                      pack=pack, tile_m=tile_m)

    return forward


def init_params(key, pc_feat_dim, out_dim, dtype=jnp.float32):
    """Deterministic synthetic init matching the nn.Linear parameter shapes."""
    k1, k2, k3, k4 = jax.random.split(key, 4)
    bound1 = 1.0 / (pc_feat_dim ** 0.5)
    bound2 = 1.0 / (out_dim ** 0.5)
    w1 = jax.random.uniform(k1, (pc_feat_dim, out_dim), dtype,
                            minval=-bound1, maxval=bound1)
    b1 = jax.random.uniform(k2, (out_dim,), dtype,
                            minval=-bound1, maxval=bound1)
    w2 = jax.random.uniform(k3, (out_dim, out_dim), dtype,
                            minval=-bound2, maxval=bound2)
    b2 = jax.random.uniform(k4, (out_dim,), dtype,
                            minval=-bound2, maxval=bound2)
    return w1, b1, w2, b2


if __name__ == "__main__":
    key = jax.random.PRNGKey(0)
    kx, kp, kx2 = jax.random.split(key, 3)

    batch, seq, pc_feat_dim, out_dim = 2, 8, 32, 32
    w1, b1, w2, b2 = init_params(kp, pc_feat_dim, out_dim)

    forward = make_corr_aggregator_cr(w1, b1, w2, b2)
    x = jax.random.normal(kx, (batch, seq, pc_feat_dim), jnp.float32)
    out = forward(x)
    jax.block_until_ready(out)
    ref = _reference(x, w1, b1, w2, b2)
    assert out.shape == (batch, seq, out_dim), out.shape
    assert jnp.allclose(out, ref, atol=1e-4, rtol=1e-4), (
        float(jnp.max(jnp.abs(out - ref))))

    # Ragged case: m = 3*67 = 201 rows -> 200-row packed prefix (25 packed
    # rows, 2 grid steps at tile_m=16, partial last block) + 1-row jnp tail.
    forward_small_tile = make_corr_aggregator_cr(w1, b1, w2, b2, tile_m=16)
    x_big = jax.random.normal(kx2, (3, 67, pc_feat_dim), jnp.float32)
    out_big = forward_small_tile(x_big)
    jax.block_until_ready(out_big)
    ref_big = _reference(x_big, w1, b1, w2, b2)
    assert out_big.shape == (3, 67, out_dim), out_big.shape
    assert jnp.allclose(out_big, ref_big, atol=1e-4, rtol=1e-4), (
        float(jnp.max(jnp.abs(out_big - ref_big))))

    print("KERNEL_OK")
</pallas_src>

<mosaic_0001>
module attributes {stable_mosaic.version = 11 : i64} {
  func.func @_mlp_kernel(%arg0: i32, %arg1: memref<2x256xf32, #tpu.memory_space<vmem>>, %arg2: memref<256x256xf32, #tpu.memory_space<vmem>>, %arg3: memref<1x256xf32, #tpu.memory_space<vmem>>, %arg4: memref<256x256xf32, #tpu.memory_space<vmem>>, %arg5: memref<1x256xf32, #tpu.memory_space<vmem>>, %arg6: memref<2x256xf32, #tpu.memory_space<vmem>>) attributes {dimension_semantics = [#tpu.dimension_semantics<parallel>], iteration_bounds = array<i64: 1>, scalar_prefetch = 0 : i64, scratch_operands = 0 : i64, tpu.core_type = #tpu.core_type<tc>, window_params = [{transform_indices = @transform_0, window_bounds = array<i64: 2, 256>}, {pipeline_mode = #tpu.pipeline_mode<synchronous>, transform_indices = @transform_1, window_bounds = array<i64: 256, 256>}, {pipeline_mode = #tpu.pipeline_mode<synchronous>, transform_indices = @transform_2, window_bounds = array<i64: 1, 256>}, {pipeline_mode = #tpu.pipeline_mode<synchronous>, transform_indices = @transform_3, window_bounds = array<i64: 256, 256>}, {pipeline_mode = #tpu.pipeline_mode<synchronous>, transform_indices = @transform_4, window_bounds = array<i64: 1, 256>}, {transform_indices = @transform_5, window_bounds = array<i64: 2, 256>}]} {
    %c0 = arith.constant 0 : index
    %c0_0 = arith.constant 0 : index
    %0 = vector.load %arg1[%c0, %c0_0] : memref<2x256xf32, #tpu.memory_space<vmem>>, vector<2x256xf32>
    %c0_1 = arith.constant 0 : index
    %c0_2 = arith.constant 0 : index
    %1 = vector.load %arg2[%c0_1, %c0_2] : memref<256x256xf32, #tpu.memory_space<vmem>>, vector<256x256xf32>
    %cst = arith.constant dense<0.000000e+00> : vector<2x256xf32>
    %2 = tpu.matmul %0, %1, %cst {dimension_numbers = #tpu.dot_dimension_numbers<[1], [0], [0], [1], [0, 0, 1, 1], [], []>} : vector<2x256xf32>, vector<256x256xf32>, vector<2x256xf32> -> vector<2x256xf32>
    %c0_3 = arith.constant 0 : index
    %c0_4 = arith.constant 0 : index
    %3 = vector.load %arg3[%c0_3, %c0_4] : memref<1x256xf32, #tpu.memory_space<vmem>>, vector<1x256xf32>
    %4 = vector.broadcast %3 : vector<1x256xf32> to vector<2x256xf32>
    %5 = arith.addf %2, %4 : vector<2x256xf32>
    %cst_5 = arith.constant 0.00999999977 : f32
    %6 = vector.broadcast %cst_5 : f32 to vector<2x256xf32>
    %7 = arith.mulf %6, %5 : vector<2x256xf32>
    %8 = arith.maximumf %5, %7 : vector<2x256xf32>
    %c0_6 = arith.constant 0 : index
    %c0_7 = arith.constant 0 : index
    %9 = vector.load %arg4[%c0_6, %c0_7] : memref<256x256xf32, #tpu.memory_space<vmem>>, vector<256x256xf32>
    %cst_8 = arith.constant dense<0.000000e+00> : vector<2x256xf32>
    %10 = tpu.matmul %8, %9, %cst_8 {dimension_numbers = #tpu.dot_dimension_numbers<[1], [0], [0], [1], [0, 0, 1, 1], [], []>} : vector<2x256xf32>, vector<256x256xf32>, vector<2x256xf32> -> vector<2x256xf32>
    %c0_9 = arith.constant 0 : index
    %c0_10 = arith.constant 0 : index
    %11 = vector.load %arg5[%c0_9, %c0_10] : memref<1x256xf32, #tpu.memory_space<vmem>>, vector<1x256xf32>
    %12 = vector.broadcast %11 : vector<1x256xf32> to vector<2x256xf32>
    %13 = arith.addf %10, %12 : vector<2x256xf32>
    %c0_11 = arith.constant 0 : index
    %c0_12 = arith.constant 0 : index
    %14 = vector.load %arg6[%c0_11, %c0_12] : memref<2x256xf32, #tpu.memory_space<vmem>>, vector<2x256xf32>
    tpu.vector_store %arg6[%c0_11, %c0_12], %13 {strides = array<i32>} : memref<2x256xf32, #tpu.memory_space<vmem>>, vector<2x256xf32>,
    return
  }
  func.func @transform_0(%arg0: i32) -> (i32, i32) {
    %c0_i32 = arith.constant 0 : i32
    %c0_i32_0 = arith.constant 0 : i32
    return %arg0, %c0_i32 : i32, i32
  }
  func.func @transform_1(%arg0: i32) -> (i32, i32) {
    %c0_i32 = arith.constant 0 : i32
    %c0_i32_0 = arith.constant 0 : i32
    %c0_i32_1 = arith.constant 0 : i32
    return %c0_i32, %c0_i32_0 : i32, i32
  }
  func.func @transform_2(%arg0: i32) -> (i32, i32) {
    %c0_i32 = arith.constant 0 : i32
    %c0_i32_0 = arith.constant 0 : i32
    %c0_i32_1 = arith.constant 0 : i32
    return %c0_i32, %c0_i32_0 : i32, i32
  }
  func.func @transform_3(%arg0: i32) -> (i32, i32) {
    %c0_i32 = arith.constant 0 : i32
    %c0_i32_0 = arith.constant 0 : i32
    %c0_i32_1 = arith.constant 0 : i32
    return %c0_i32, %c0_i32_0 : i32, i32
  }
  func.func @transform_4(%arg0: i32) -> (i32, i32) {
    %c0_i32 = arith.constant 0 : i32
    %c0_i32_0 = arith.constant 0 : i32
    %c0_i32_1 = arith.constant 0 : i32
    return %c0_i32, %c0_i32_0 : i32, i32
  }
  func.func @transform_5(%arg0: i32) -> (i32, i32) {
    %c0_i32 = arith.constant 0 : i32
    %c0_i32_0 = arith.constant 0 : i32
    return %arg0, %c0_i32 : i32, i32
  }
}

</mosaic_0001>

<bundles_post_ra>
// kernel: _apply.1
= control target key start
LH: loop header
LB: loop body
LE: loop exit
PB: predicated region body
PF: predicated region fallthrough
CT: control target
= control target key end

     0   :  { %10 = vsyncpa [#allocation3], 0  ;;  %s633_s0 = inlined_call_operand.vmem [shape: f32[2,256], index: 0, kind: input, shape index: {}]   ;;  %s634_s1 = inlined_call_operand.hbm [shape: f32[256,256], index: 1, kind: input, shape index: {}]   ;;  %s635_s2 = inlined_call_operand.vmem [shape: f32[1,256], index: 2, kind: input, shape index: {}]   ;;  %s636_s3 = inlined_call_operand.hbm [shape: f32[256,256], index: 3, kind: input, shape index: {}]   ;;  %s637_s4 = inlined_call_operand.vmem [shape: f32[1,256], index: 4, kind: input, shape index: {}]   ;;  %s638_s5 = inlined_call_operand.vmem [shape: f32[2,256], index: 5, kind: output, shape index: {}]  }
   0x1   :  { %11 = vsyncpa [#allocation5], 0  ;;  %s558_s18 = smov [#allocation2]   ;;  %s510_s22 = scalar_lea.hbm %s634_s1, 8192 }
   0x2   :  { %s19_s19 = sshll.u32 %s558_s18, 4  ;;  %p511_p0 = scmp.ne.s32.totalorder %s634_s1, %s510_s22  ;;  %s20_s19 = int_to_ptr.vmem [resolvable:$true] %s19_s19 }
   0x3   :  { %p514_p1 = scmp.lt.u32.totalorder %s510_s22, %s634_s1 }
   0x5   :  { %p516_p2 = pnand %p514_p1, %p511_p0 }
   0x7   :  { %519 = shalt.err (!%p516_p2)
}
   0x8   :  { %s520_s27 = scalar_lea.vmem %s20_s19, 8192  ;;  %p525_p4 = scmp.lt.s32.totalorder %s20_s19, %s20_s19 }
   0x9   :  { %p521_p3 = scmp.ne.s32.totalorder %s20_s19, %s520_s27  ;;  %p526_p5 = scmp.lt.s32.totalorder %s520_s27, %s520_s27 }
   0xb   :  { %p527_p6 = por %p526_p5, %p525_p4 }
   0xd   :  { %p528_p7 = pnand %p527_p6, %p521_p3 }
   0xf   :  { %531 = shalt.err (!%p528_p7)
}
  0x10   :  { %s559_s28 = smov 256   ;;  %s560_s29 = smov 16  }
  0x11   :  { %25 = dma.hbm_to_vmem [thread:$0]  %s634_s1, 8192, %s20_s19, [#allocation3], %s559_s28, %s559_s28, %s560_s29  }
  0x12   :  { %s561_s7 = smov [#allocation4]   ;;  %s532_s11 = scalar_lea.hbm %s636_s3, 8192 }
  0x13   :  { %s33_s8 = sshll.u32 %s561_s7, 4  ;;  %p533_p8 = scmp.ne.s32.totalorder %s636_s3, %s532_s11  ;;  %s34_s8 = int_to_ptr.vmem [resolvable:$true] %s33_s8 }
  0x14   :  { %p536_p9 = scmp.lt.u32.totalorder %s532_s11, %s636_s3 }
  0x16   :  { %p538_p10 = pnand %p536_p9, %p533_p8 }
  0x18   :  { %541 = shalt.err (!%p538_p10)
}
  0x19   :  { %s542_s16 = scalar_lea.vmem %s34_s8, 8192  ;;  %p547_p12 = scmp.lt.s32.totalorder %s34_s8, %s34_s8 }
  0x1a   :  { %p543_p11 = scmp.ne.s32.totalorder %s34_s8, %s542_s16  ;;  %p548_p13 = scmp.lt.s32.totalorder %s542_s16, %s542_s16 }
  0x1c   :  { %p549_p0 = por %p548_p13, %p547_p12 }
  0x1e   :  { %p550_p1 = pnand %p549_p0, %p543_p11 }
  0x20   :  { %553 = shalt.err (!%p550_p1)
}
  0x21   :  { %39 = dma.hbm_to_vmem [thread:$0]  %s636_s3, 8192, %s34_s8, [#allocation5], %s559_s28, %s559_s28, %s560_s29  }
  0x22   :  { %554 = dma.done.wait [#allocation3], 8192  }
  0x23   :  { %555 = vsyncadd [#allocation3], 4294959104 }
  0x24   :  { %556 = dma.done.wait [#allocation5], 8192  }
  0x25   :  { %557 = vsyncadd [#allocation5], 4294959104  ;;  %v50_v0 = vld [vmem:[#allocation2 + $0x8] sm:$0xff]  ;;  %v52_v1 = vld [vmem:[#allocation2 + $0x18] sm:$0xff] }
  0x26   :  { %v49_v2 = vld [vmem:[#allocation2] sm:$0xff]  ;;  %v378_v3 = vpack.c.bf16 %v52_v1, %v50_v0  ;;  %v51_v4 = vld [vmem:[#allocation2 + $0x10] sm:$0xff]  ;;  %v54_v5 = vld [vmem:[#allocation2 + $0x28] sm:$0xff] }
  0x27   :  { %v56_v6 = vld [vmem:[#allocation2 + $0x38] sm:$0xff]  ;;  %v380_v7 = vpack.c.bf16 %v51_v4, %v49_v2  ;;  %v53_v9 = vld [vmem:[#allocation2 + $0x20] sm:$0xff]  ;;  %v55_v10 = vld [vmem:[#allocation2 + $0x30] sm:$0xff] }
  0x28   :  { %v382_v8 = vpack.c.bf16 %v56_v6, %v54_v5  ;;  %v58_v11 = vld [vmem:[#allocation2 + $0x48] sm:$0xff]  ;;  %379 = vmatprep.subr.bf16.mxu0 %v378_v3  ;;  %v60_v12 = vld [vmem:[#allocation2 + $0x58] sm:$0xff]  ;;  %v384_v13 = vpack.c.bf16 %v55_v10, %v53_v9  ;;  %v57_v15 = vld [vmem:[#allocation2 + $0x40] sm:$0xff] }
  0x29   :  { %381 = vmatpush1.bf16.msra.mxu0 %v380_v7  ;;  %v386_v14 = vpack.c.bf16 %v60_v12, %v58_v11  ;;  %v59_v16 = vld [vmem:[#allocation2 + $0x50] sm:$0xff]  ;;  %v62_v17 = vld [vmem:[#allocation2 + $0x68] sm:$0xff]  ;;  %v64_v18 = vld [vmem:[#allocation2 + $0x78] sm:$0xff] }
  0x2a   :  { %383 = vmatprep.subr.bf16.mxu0 %v382_v8  ;;  %v388_v19 = vpack.c.bf16 %v59_v16, %v57_v15  ;;  %v390_v20 = vpack.c.bf16 %v64_v18, %v62_v17  ;;  %v61_v21 = vld [vmem:[#allocation2 + $0x60] sm:$0xff]  ;;  %v63_v22 = vld [vmem:[#allocation2 + $0x70] sm:$0xff]  ;;  %v66_v23 = vld [vmem:[#allocation2 + $0x88] sm:$0xff] }
  0x2b   :  { %v68_v24 = vld [vmem:[#allocation2 + $0x98] sm:$0xff]  ;;  %v392_v25 = vpack.c.bf16 %v63_v22, %v61_v21  ;;  %v65_v27 = vld [vmem:[#allocation2 + $0x80] sm:$0xff]  ;;  %v67_v28 = vld [vmem:[#allocation2 + $0x90] sm:$0xff] }
  0x2c   :  { %v394_v26 = vpack.c.bf16 %v68_v24, %v66_v23  ;;  %v70_v29 = vld [vmem:[#allocation2 + $0xa8] sm:$0xff]  ;;  %v72_v30 = vld [vmem:[#allocation2 + $0xb8] sm:$0xff]  ;;  %v396_v31 = vpack.c.bf16 %v67_v28, %v65_v27  ;;  %v69_v33 = vld [vmem:[#allocation2 + $0xa0] sm:$0xff] }
  0x2d   :  { %385 = vmatpush1.bf16.msra.mxu0 %v384_v13  ;;  %v398_v32 = vpack.c.bf16 %v72_v30, %v70_v29  ;;  %v71_v34 = vld [vmem:[#allocation2 + $0xb0] sm:$0xff]  ;;  %v74_v35 = vld [vmem:[#allocation2 + $0xc8] sm:$0xff]  ;;  %v76_v36 = vld [vmem:[#allocation2 + $0xd8] sm:$0xff] }
  0x2e   :  { %387 = vmatprep.subr.bf16.mxu0 %v386_v14  ;;  %v400_v37 = vpack.c.bf16 %v71_v34, %v69_v33  ;;  %v73_v38 = vld [vmem:[#allocation2 + $0xc0] sm:$0xff]  ;;  %v75_v39 = vld [vmem:[#allocation2 + $0xd0] sm:$0xff]  ;;  %v78_v40 = vld [vmem:[#allocation2 + $0xe8] sm:$0xff]  ;;  %v402_v41 = vpack.c.bf16 %v76_v36, %v74_v35 }
  0x2f   :  { %v80_v42 = vld [vmem:[#allocation2 + $0xf8] sm:$0xff]  ;;  %v619_v43 = vld.sshfl [vmem:[%s633_s0] sm:$0x33 pattern:$0x76325410]  ;;  %v212_v44 = vld [vmem:[#allocation4 + $0x8] sm:$0xff]  ;;  %v404_v54 = vpack.c.bf16 %v75_v39, %v73_v38 }
  0x30   :  { %v133_v45 = vcombine.high %v619_v43, %v619_v43  ;;  %v214_v46 = vld [vmem:[#allocation4 + $0x18] sm:$0xff]  ;;  %v211_v47 = vld [vmem:[#allocation4] sm:$0xff]  ;;  %v213_v48 = vld [vmem:[#allocation4 + $0x10] sm:$0xff]  ;;  %v406_v59 = vpack.c.bf16 %v80_v42, %v78_v40 }
  0x31   :  { %389 = vmatpush1.bf16.msra.mxu0 %v388_v19  ;;  %v442_v49 = vpack.c.bf16 %v214_v46, %v212_v44  ;;  %v444_v50 = vpack.c.bf16 %v213_v48, %v211_v47  ;;  %v216_v51 = vld [vmem:[#allocation4 + $0x28] sm:$0xff]  ;;  %v218_v52 = vld [vmem:[#allocation4 + $0x38] sm:$0xff]  ;;  %v215_v53 = vld [vmem:[#allocation4 + $0x20] sm:$0xff] }
  0x32   :  { %391 = vmatprep.subr.bf16.mxu0 %v390_v20  ;;  %200 = vmatprep.mubr.f32.mxu0 %v133_v45  ;;  %v446_v55 = vpack.c.bf16 %v218_v52, %v216_v51  ;;  %v217_v56 = vld [vmem:[#allocation4 + $0x30] sm:$0xff]  ;;  %v220_v57 = vld [vmem:[#allocation4 + $0x48] sm:$0xff]  ;;  %v222_v58 = vld [vmem:[#allocation4 + $0x58] sm:$0xff] }
  0x33   :  { %v77_v60 = vld [vmem:[#allocation2 + $0xe0] sm:$0xff]  ;;  %v79_v61 = vld [vmem:[#allocation2 + $0xf0] sm:$0xff]  ;;  %443 = vmatprep.subr.bf16.mxu1 %v442_v49  ;;  %v82_v62 = vld [vmem:[#allocation2 + $0x108] sm:$0xff]  ;;  %v448_v0 = vpack.c.bf16 %v217_v56, %v215_v53  ;;  %v450_v1 = vpack.c.bf16 %v222_v58, %v220_v57 }
  0x34   :  { %v84_v63 = vld [vmem:[#allocation2 + $0x118] sm:$0xff]  ;;  %445 = vmatpush1.bf16.msra.mxu1 %v444_v50  ;;  %v219_v2 = vld [vmem:[#allocation4 + $0x40] sm:$0xff]  ;;  %v221_v3 = vld [vmem:[#allocation4 + $0x50] sm:$0xff]  ;;  %v408_v4 = vpack.c.bf16 %v79_v61, %v77_v60 }
  0x35   :  { %393 = vmatpush1.bf16.msra.mxu0 %v392_v25  ;;  %447 = vmatprep.subr.bf16.mxu1 %v446_v55  ;;  %v224_v5 = vld [vmem:[#allocation4 + $0x68] sm:$0xff]  ;;  %v226_v6 = vld [vmem:[#allocation4 + $0x78] sm:$0xff]  ;;  %v410_v7 = vpack.c.bf16 %v84_v63, %v82_v62  ;;  %v81_v8 = vld [vmem:[#allocation2 + $0x100] sm:$0xff]  ;;  %v452_v12 = vpack.c.bf16 %v221_v3, %v219_v2 }
  0x36   :  { %395 = vmatprep.subr.bf16.mxu0 %v394_v26  ;;  %v83_v9 = vld [vmem:[#allocation2 + $0x110] sm:$0xff]  ;;  %v86_v10 = vld [vmem:[#allocation2 + $0x128] sm:$0xff]  ;;  %v88_v11 = vld [vmem:[#allocation2 + $0x138] sm:$0xff]  ;;  %v454_v13 = vpack.c.bf16 %v226_v6, %v224_v5 }
  0x37   :  { %v223_v14 = vld [vmem:[#allocation4 + $0x60] sm:$0xff]  ;;  %v225_v15 = vld [vmem:[#allocation4 + $0x70] sm:$0xff]  ;;  %v412_v16 = vpack.c.bf16 %v83_v9, %v81_v8  ;;  %v228_v17 = vld [vmem:[#allocation4 + $0x88] sm:$0xff]  ;;  %v414_v19 = vpack.c.bf16 %v88_v11, %v86_v10 }
  0x38   :  { %449 = vmatpush1.bf16.msra.mxu1 %v448_v0  ;;  %v230_v18 = vld [vmem:[#allocation4 + $0x98] sm:$0xff]  ;;  %v85_v20 = vld [vmem:[#allocation2 + $0x120] sm:$0xff]  ;;  %v87_v21 = vld [vmem:[#allocation2 + $0x130] sm:$0xff]  ;;  %v456_v24 = vpack.c.bf16 %v225_v15, %v223_v14 }
  0x39   :  { %397 = vmatpush1.bf16.msra.mxu0 %v396_v31  ;;  %451 = vmatprep.subr.bf16.mxu1 %v450_v1  ;;  %v90_v22 = vld [vmem:[#allocation2 + $0x148] sm:$0xff]  ;;  %v92_v23 = vld [vmem:[#allocation2 + $0x158] sm:$0xff]  ;;  %v458_v25 = vpack.c.bf16 %v230_v18, %v228_v17  ;;  %v227_v26 = vld [vmem:[#allocation4 + $0x80] sm:$0xff]  ;;  %v416_v28 = vpack.c.bf16 %v87_v21, %v85_v20 }
  0x3a   :  { %399 = vmatprep.subr.bf16.mxu0 %v398_v32  ;;  %v229_v27 = vld [vmem:[#allocation4 + $0x90] sm:$0xff]  ;;  %v232_v29 = vld [vmem:[#allocation4 + $0xa8] sm:$0xff]  ;;  %v234_v30 = vld [vmem:[#allocation4 + $0xb8] sm:$0xff]  ;;  %v418_v31 = vpack.c.bf16 %v92_v23, %v90_v22 }
  0x3b   :  { %v89_v32 = vld [vmem:[#allocation2 + $0x140] sm:$0xff]  ;;  %v91_v33 = vld [vmem:[#allocation2 + $0x150] sm:$0xff]  ;;  %v94_v34 = vld [vmem:[#allocation2 + $0x168] sm:$0xff]  ;;  %v460_v36 = vpack.c.bf16 %v229_v27, %v227_v26 }
  0x3c   :  { %453 = vmatpush1.bf16.msra.mxu1 %v452_v12  ;;  %v96_v35 = vld [vmem:[#allocation2 + $0x178] sm:$0xff]  ;;  %v231_v38 = vld [vmem:[#allocation4 + $0xa0] sm:$0xff]  ;;  %v233_v39 = vld [vmem:[#allocation4 + $0xb0] sm:$0xff]  ;;  %v420_v40 = vpack.c.bf16 %v91_v33, %v89_v32 }
  0x3d   :  { %401 = vmatpush1.bf16.msra.mxu0 %v400_v37  ;;  %455 = vmatprep.subr.bf16.mxu1 %v454_v13  ;;  %v462_v37 = vpack.c.bf16 %v234_v30, %v232_v29  ;;  %v238_v42 = vld [vmem:[#allocation4 + $0xd8] sm:$0xff]  ;;  %v422_v44 = vpack.c.bf16 %v96_v35, %v94_v34  ;;  %v93_v45 = vld [vmem:[#allocation2 + $0x160] sm:$0xff]  ;;  %v95_v46 = vld [vmem:[#allocation2 + $0x170] sm:$0xff]  ;;  %v464_v49 = vpack.c.bf16 %v233_v39, %v231_v38 }
  0x3e   :  { %403 = vmatprep.subr.bf16.mxu0 %v402_v41  ;;  %v236_v41 = vld [vmem:[#allocation4 + $0xc8] sm:$0xff]  ;;  %v100_v48 = vld [vmem:[#allocation2 + $0x198] sm:$0xff]  ;;  %v235_v51 = vld [vmem:[#allocation4 + $0xc0] sm:$0xff]  ;;  %v424_v53 = vpack.c.bf16 %v95_v46, %v93_v45 }
  0x3f   :  { %v98_v47 = vld [vmem:[#allocation2 + $0x188] sm:$0xff]  ;;  %v466_v50 = vpack.c.bf16 %v238_v42, %v236_v41  ;;  %v237_v52 = vld [vmem:[#allocation4 + $0xd0] sm:$0xff]  ;;  %v242_v55 = vld [vmem:[#allocation4 + $0xf8] sm:$0xff] }
  0x40   :  { %457 = vmatpush1.bf16.msra.mxu1 %v456_v24  ;;  %v426_v56 = vpack.c.bf16 %v100_v48, %v98_v47  ;;  %v97_v57 = vld [vmem:[#allocation2 + $0x180] sm:$0xff]  ;;  %v99_v58 = vld [vmem:[#allocation2 + $0x190] sm:$0xff]  ;;  %v104_v60 = vld [vmem:[#allocation2 + $0x1b8] sm:$0xff]  ;;  %v468_v61 = vpack.c.bf16 %v237_v52, %v235_v51 }
  0x41   :  { %405 = vmatpush1.bf16.msra.mxu0 %v404_v54  ;;  %459 = vmatprep.subr.bf16.mxu1 %v458_v25  ;;  %v240_v54 = vld [vmem:[#allocation4 + $0xe8] sm:$0xff]  ;;  %v239_v63 = vld [vmem:[#allocation4 + $0xe0] sm:$0xff]  ;;  %v241_v0 = vld [vmem:[#allocation4 + $0xf0] sm:$0xff]  ;;  %v428_v1 = vpack.c.bf16 %v99_v58, %v97_v57 }
  0x42   :  { %407 = vmatprep.subr.bf16.mxu0 %v406_v59  ;;  %v102_v59 = vld [vmem:[#allocation2 + $0x1a8] sm:$0xff]  ;;  %v470_v62 = vpack.c.bf16 %v242_v55, %v240_v54  ;;  %v246_v3 = vld [vmem:[#allocation4 + $0x118] sm:$0xff]  ;;  %v101_v5 = vld [vmem:[#allocation2 + $0x1a0] sm:$0xff]  ;;  %v472_v9 = vpack.c.bf16 %v241_v0, %v239_v63 }
  0x43   :  { %v244_v2 = vld [vmem:[#allocation4 + $0x108] sm:$0xff]  ;;  %v103_v6 = vld [vmem:[#allocation2 + $0x1b0] sm:$0xff]  ;;  %v108_v8 = vld [vmem:[#allocation2 + $0x1d8] sm:$0xff] }
  0x44   :  { %461 = vmatpush1.bf16.msra.mxu1 %v460_v36  ;;  %v474_v10 = vpack.c.bf16 %v246_v3, %v244_v2  ;;  %v243_v11 = vld [vmem:[#allocation4 + $0x100] sm:$0xff]  ;;  %v245_v12 = vld [vmem:[#allocation4 + $0x110] sm:$0xff]  ;;  %v432_v13 = vpack.c.bf16 %v103_v6, %v101_v5  ;;  %v248_v14 = vld [vmem:[#allocation4 + $0x128] sm:$0xff]  ;;  %v115_v3 = vlaneseq }
  0x45   :  { %409 = vmatpush1.bf16.msra.mxu0 %v408_v4  ;;  %463 = vmatprep.subr.bf16.mxu1 %v462_v37  ;;  %v430_v4 = vpack.c.bf16 %v104_v60, %v102_v59  ;;  %v250_v15 = vld [vmem:[#allocation4 + $0x138] sm:$0xff]  ;;  %v105_v17 = vld [vmem:[#allocation2 + $0x1c0] sm:$0xff]  ;;  %v107_v18 = vld [vmem:[#allocation2 + $0x1d0] sm:$0xff]  ;;  %v476_v21 = vpack.c.bf16 %v245_v12, %v243_v11 }
  0x46   :  { %411 = vmatprep.subr.bf16.mxu0 %v410_v7  ;;  %v106_v7 = vld [vmem:[#allocation2 + $0x1c8] sm:$0xff]  ;;  %v112_v20 = vld [vmem:[#allocation2 + $0x1f8] sm:$0xff]  ;;  %v478_v22 = vpack.c.bf16 %v250_v15, %v248_v14  ;;  %v247_v23 = vld [vmem:[#allocation4 + $0x120] sm:$0xff]  ;;  %v436_v25 = vpack.c.bf16 %v107_v18, %v105_v17 }
  0x47   :  { %v249_v24 = vld [vmem:[#allocation4 + $0x130] sm:$0xff]  ;;  %v252_v26 = vld [vmem:[#allocation4 + $0x148] sm:$0xff]  ;;  %v254_v27 = vld [vmem:[#allocation4 + $0x158] sm:$0xff] }
  0x48   :  { %465 = vmatpush1.bf16.msra.mxu1 %v464_v49  ;;  %v109_v29 = vld [vmem:[#allocation2 + $0x1e0] sm:$0xff]  ;;  %v111_v30 = vld [vmem:[#allocation2 + $0x1f0] sm:$0xff]  ;;  %v482_v32 = vpack.c.bf16 %v254_v27, %v252_v26  ;;  %v256_v36 = vld [vmem:[#allocation4 + $0x168] sm:$0xff] }
  0x49   :  { %413 = vmatpush1.bf16.msra.mxu0 %v412_v16  ;;  %467 = vmatprep.subr.bf16.mxu1 %v466_v50  ;;  %v434_v16 = vpack.c.bf16 %v108_v8, %v106_v7  ;;  %v251_v33 = vld [vmem:[#allocation4 + $0x140] sm:$0xff]  ;;  %v253_v34 = vld [vmem:[#allocation4 + $0x150] sm:$0xff]  ;;  %v440_v35 = vpack.c.bf16 %v111_v30, %v109_v29  ;;  %v258_v37 = vld [vmem:[#allocation4 + $0x178] sm:$0xff] }
  0x4a   :  { %415 = vmatprep.subr.bf16.mxu0 %v414_v19  ;;  %v110_v19 = vld [vmem:[#allocation2 + $0x1e8] sm:$0xff]  ;;  %v484_v38 = vpack.c.bf16 %v253_v34, %v251_v33  ;;  %v486_v39 = vpack.c.bf16 %v258_v37, %v256_v36  ;;  %v257_v41 = vld [vmem:[#allocation4 + $0x170] sm:$0xff]  ;;  %v259_v47 = vld [vmem:[#allocation4 + $0x180] sm:$0xff] }
  0x4b   :  { %v260_v42 = vld [vmem:[#allocation4 + $0x188] sm:$0xff]  ;;  %v261_v48 = vld [vmem:[#allocation4 + $0x190] sm:$0xff]  ;;  %v266_v50 = vld [vmem:[#allocation4 + $0x1b8] sm:$0xff] }
  0x4c   :  { %469 = vmatpush1.bf16.msra.mxu1 %v468_v61  ;;  %v264_v49 = vld [vmem:[#allocation4 + $0x1a8] sm:$0xff]  ;;  %v492_v51 = vpack.c.bf16 %v261_v48, %v259_v47  ;;  %v265_v54 = vld [vmem:[#allocation4 + $0x1b0] sm:$0xff]  ;;  %v270_v57 = vld [vmem:[#allocation4 + $0x1d8] sm:$0xff] }
  0x4d   :  { %417 = vmatpush1.bf16.msra.mxu0 %v416_v28  ;;  %471 = vmatprep.subr.bf16.mxu1 %v470_v62  ;;  %v438_v28 = vpack.c.bf16 %v112_v20, %v110_v19  ;;  %v494_v52 = vpack.c.bf16 %v266_v50, %v264_v49  ;;  %v269_v59 = vld [vmem:[#allocation4 + $0x1d0] sm:$0xff]  ;;  %v272_v61 = vld [vmem:[#allocation4 + $0x1e8] sm:$0xff]  ;;  %v274_v62 = vld [vmem:[#allocation4 + $0x1f8] sm:$0xff] }
  0x4e   :  { %419 = vmatprep.subr.bf16.mxu0 %v418_v31  ;;  %v480_v31 = vpack.c.bf16 %v249_v24, %v247_v23  ;;  %v502_v63 = vpack.c.bf16 %v274_v62, %v272_v61  ;;  %v271_v0 = vld [vmem:[#allocation4 + $0x1e0] sm:$0xff] }
  0x4f   :  { %v113_v6 = vld [vmem:[%s635_s2] sm:$0x3] }
  0x50   :  { %473 = vmatpush1.bf16.msra.mxu1 %v472_v9  ;;  %v275_v18 = vld [vmem:[%s637_s4] sm:$0x3] }
  0x51   :  { %421 = vmatpush1.bf16.msra.mxu0 %v420_v40  ;;  %475 = vmatprep.subr.bf16.mxu1 %v474_v10  ;;  %v255_v40 = vld [vmem:[#allocation4 + $0x160] sm:$0xff] }
  0x52   :  { %423 = vmatprep.subr.bf16.mxu0 %v422_v44  ;;  %v262_v44 = vld [vmem:[#allocation4 + $0x198] sm:$0xff]  ;;  %v488_v45 = vpack.c.bf16 %v257_v41, %v255_v40 }
  0x53   :  { %v490_v46 = vpack.c.bf16 %v262_v44, %v260_v42 }
  0x54   :  { %477 = vmatpush1.bf16.msra.mxu1 %v476_v21 }
  0x55   :  { %425 = vmatpush1.bf16.msra.mxu0 %v424_v53  ;;  %479 = vmatprep.subr.bf16.mxu1 %v478_v22  ;;  %v263_v53 = vld [vmem:[#allocation4 + $0x1a0] sm:$0xff] }
  0x56   :  { %427 = vmatprep.subr.bf16.mxu0 %v426_v56  ;;  %v496_v55 = vpack.c.bf16 %v265_v54, %v263_v53  ;;  %v268_v56 = vld [vmem:[#allocation4 + $0x1c8] sm:$0xff] }
  0x57   :  { %v498_v58 = vpack.c.bf16 %v270_v57, %v268_v56 }
  0x58   :  { %481 = vmatpush1.bf16.msra.mxu1 %v480_v31 }
  0x59   :  { %429 = vmatpush1.bf16.msra.mxu0 %v428_v1  ;;  %483 = vmatprep.subr.bf16.mxu1 %v482_v32  ;;  %v273_v1 = vld [vmem:[#allocation4 + $0x1f0] sm:$0xff] }
  0x5a   :  { %431 = vmatprep.subr.bf16.mxu0 %v430_v4  ;;  %v504_v2 = vpack.c.bf16 %v273_v1, %v271_v0  ;;  %v116_v4 = vshrl.u32 %v115_v3, 7 }
  0x5c   :  { %485 = vmatpush1.bf16.msra.mxu1 %v484_v38  ;;  %v117_v5 = vsub.s32 0, %v116_v4  ;;  %v121_v7 = vsub.s32 1, %v116_v4 }
  0x5d   :  { %433 = vmatpush1.bf16.msra.mxu0 %v432_v13  ;;  %487 = vmatprep.subr.bf16.mxu1 %v486_v39 }
  0x5e   :  { %435 = vmatprep.subr.bf16.mxu0 %v434_v16  ;;  %v118_v8 = vrot.slane %v113_v6, %v117_v5  ;;  %v122_v9 = vrot.slane %v113_v6, %v121_v7  ;;  %v280_v19 = vrot.slane %v275_v18, %v117_v5  ;;  %v284_v20 = vrot.slane %v275_v18, %v121_v7 }
  0x60   :  { %489 = vmatpush1.bf16.msra.mxu1 %v488_v45 }
  0x61   :  { %437 = vmatpush1.bf16.msra.mxu0 %v436_v25  ;;  %491 = vmatprep.subr.bf16.mxu1 %v490_v46 }
  0x62   :  { %439 = vmatprep.subr.bf16.mxu0 %v438_v28 }
  0x64   :  { %493 = vmatpush1.bf16.msra.mxu1 %v492_v51 }
  0x65   :  { %441 = vmatpush1.bf16.msra.mxu0 %v440_v35  ;;  %495 = vmatprep.subr.bf16.mxu1 %v494_v52 }
  0x68   :  { %201 = vmatmul.mubr.f32.vlgmr.msra.gmra.mrb[0].mxu0 %v619_v43  ;;  %497 = vmatpush1.bf16.msra.mxu1 %v496_v55  ;;  %v267_v43 = vld [vmem:[#allocation4 + $0x1c0] sm:$0xff] }
  0x69   :  { %v500_v60 = vpack.c.bf16 %v269_v59, %v267_v43  ;;  %499 = vmatprep.subr.bf16.mxu1 %v498_v58 }
  0x6c   :  { %501 = vmatpush1.bf16.msra.mxu1 %v500_v60 }
  0x6d   :  { %503 = vmatprep.subr.bf16.mxu1 %v502_v63 }
  0x70   :  { %505 = vmatpush1.bf16.msra.mxu1 %v504_v2 }
 0x13b   :  { %v202_v10 = vpop.f32.mrb[0].mxu0 }
 0x13c   :  { %v203_v11 = vadd.f32 %v202_v10, %v118_v8  ;;  %v204_v12 = vpop.f32.mrb[1].mxu0 }
 0x13d   :  { %v205_v13 = vadd.f32 %v204_v12, %v122_v9 }
 0x13e   :  { %v207_v14 = vmul.f32 0.01, %v203_v11 }
 0x13f   :  { %v208_v15 = vmul.f32 0.01, %v205_v13 }
 0x140   :  { %v209_v17 = vmax.f32 %v203_v11, %v207_v14 }
 0x141   :  { %v210_v16 = vmax.f32 %v205_v13, %v208_v15 }
 0x143   :  { %351 = vmatprep.mubr.f32.mxu1 %v210_v16 }
 0x144   :  { %352 = vmatmul.mubr.f32.vlgmr.msra.gmra.mrb[0].mxu1 %v209_v17 }
 0x217   :  { %v353_v21 = vpop.f32.mrb[0].mxu1 }
 0x218   :  { %v354_v22 = vadd.f32 %v353_v21, %v280_v19  ;;  %v355_v23 = vpop.f32.mrb[1].mxu1 }
 0x219   :  { %v356_v24 = vadd.f32 %v355_v23, %v284_v20 }
 0x21b   :  { %v360_v25 = vcombine.low %v354_v22, %v356_v24 }
 0x21d   :  { %377 = vst.sshfl [vmem:[%s638_s5] sm:$0x33 pattern:$0x76325410] %v360_v25 }
 0x21e   :  { %374 = vsyncpa [#allocation3], 1 }
 0x21f   :  { %375 = vsyncpa [#allocation5], 1 }

</bundles_post_ra>
